<compile_context>
chip_gen: v5e
topology: v5e:2x2
jax: 0.10.0
libtpu: 0.0.40
codegen_flags: <defaults>
</compile_context>

<pallas_src>
import math
from functools import partial

import jax
import jax.numpy as jnp
from jax.experimental import pallas as pl
from jax.experimental.pallas import tpu as pltpu


# Matmul operand dtype: bf16 is MXU-native on v5e/v6e/v7x (2x throughput, half
# the operand DMA). Accumulation and softmax state stay f32.
MATMUL_DTYPE = jnp.bfloat16

NEG_INF = -1e30


# ----------------------------------------------------------------------------
# generation-aware configuration
# ----------------------------------------------------------------------------

def _tpu_vmem_capacity():
    try:
        info = pltpu.get_tpu_info()
        for name in ("vmem_capacity_bytes", "vmem_bytes", "vmem_size_bytes"):
            val = getattr(info, name, None)
            if val:
                return int(val)
    except Exception:
        pass
    return 64 * 1024 * 1024          # conservative default: v7x per-TC VMEM


_VMEM_CAP = _tpu_vmem_capacity()
_BIG_VMEM = _VMEM_CAP >= 96 * 1024 * 1024            # v5e/v6e: 128 MiB, v7x: 64 MiB
_VMEM_LIMIT = (96 if _BIG_VMEM else 48) * 1024 * 1024
_BLOCK_M = 1024 if _BIG_VMEM else 512                # row tile for linear/epilogue
_ATTN_TQ = 256 if _BIG_VMEM else 128                 # dst-row tile (multiple of 32)
_ATTN_TK = 512 if _BIG_VMEM else 256                 # src-row tile (multiple of 128)


# ----------------------------------------------------------------------------
# small helpers
# ----------------------------------------------------------------------------

def _round_up(x, m):
    return ((x + m - 1) // m) * m


def _row_tile(n, cap, sub=32):
    """Row-tile size. Small n -> one full tile (block dim spans the padded
    array, exempt from dtype sublane-tiling rules). Otherwise a multiple of 32
    (covers f32/bf16/int8 sublane tiling) aimed at >=2 tiles so both v7x
    TensorCores get work on the 'parallel' axis."""
    n8 = _round_up(n, 8)
    if n8 <= 2 * sub:
        return n8
    half = _round_up((n + 1) // 2, sub)
    return max(sub, min(cap, half))


def _pad_rows(x, rows):
    return x if x.shape[0] == rows else jnp.pad(x, ((0, rows - x.shape[0]), (0, 0)))


def _block_diag(rel):
    """(H, D, D) per-head relation matrices -> (H*D, H*D) block-diagonal."""
    h, d, _ = rel.shape
    out = jnp.zeros((h * d, h * d), rel.dtype)
    for i in range(h):
        out = out.at[i * d:(i + 1) * d, i * d:(i + 1) * d].set(rel[i])
    return out


def _erf(x):
    # Abramowitz & Stegun 7.1.26 (|err| <= 1.5e-7 ~ f32 eps): keeps torch's
    # exact-GELU semantics without relying on an erf lowering inside Mosaic.
    a1, a2, a3 = 0.254829592, -0.284496736, 1.421413741
    a4, a5, p = -1.453152027, 1.061405429, 0.3275911
    sgn = jnp.where(x >= 0.0, 1.0, -1.0)
    z = jnp.abs(x)
    t = 1.0 / (1.0 + p * z)
    poly = ((((a5 * t + a4) * t + a3) * t + a2) * t + a1) * t
    return sgn * (1.0 - poly * jnp.exp(-z * z))


def _gelu(x):
    return 0.5 * x * (1.0 + _erf(x * (1.0 / math.sqrt(2.0))))


# ----------------------------------------------------------------------------
# kernel 1: tiled dense layer  y = x @ W + b  (+ optional fused ReLU)
# ----------------------------------------------------------------------------

def _linear_kernel(x_ref, w_ref, b_ref, o_ref, *, post_act):
    y = jnp.dot(x_ref[...].astype(MATMUL_DTYPE), w_ref[...],
                preferred_element_type=jnp.float32)
    y = y + b_ref[...]
    if post_act == "relu":
        y = jnp.maximum(y, 0.0)
    o_ref[...] = y.astype(o_ref.dtype)


def linear(x, w, b, *, post_act="none", out_dtype=jnp.float32, block_m=None):
    """torch.nn.Linear: y = x @ w + b (w already (in, out)). Row-tiled, with
    optional output-column tiling so a huge resident weight cannot blow the
    v7x 64 MiB VMEM budget."""
    n, in_c = x.shape
    out_c = w.shape[1]
    tm = _row_tile(n, block_m or _BLOCK_M)
    n_p = _round_up(n, tm)

    w = w.astype(MATMUL_DTYPE)                   # halve weight DMA, MXU-native
    b = b.astype(jnp.float32)
    if out_c > 512 and in_c * out_c * w.dtype.itemsize > 8 * 1024 * 1024:
        tn = 512                                 # column-tile large weights
    else:
        tn = out_c
    oc_p = _round_up(out_c, tn)
    if oc_p != out_c:
        w = jnp.pad(w, ((0, 0), (0, oc_p - out_c)))
        b = jnp.pad(b, (0, oc_p - out_c))

    out = pl.pallas_call(
        partial(_linear_kernel, post_act=post_act),
        out_shape=jax.ShapeDtypeStruct((n_p, oc_p), out_dtype),
        grid=(n_p // tm, oc_p // tn),
        in_specs=[
            pl.BlockSpec((tm, in_c), lambda i, j: (i, 0)),
            pl.BlockSpec((in_c, tn), lambda i, j: (0, j)),
            pl.BlockSpec((1, tn), lambda i, j: (0, j)),
        ],
        out_specs=pl.BlockSpec((tm, tn), lambda i, j: (i, j)),
        compiler_params=pltpu.CompilerParams(
            dimension_semantics=("parallel", "parallel"),
            vmem_limit_bytes=_VMEM_LIMIT),
    )(_pad_rows(x, n_p), w, b.reshape(1, oc_p))
    return out[:n, :out_c]


# ----------------------------------------------------------------------------
# kernel 2: flash-style HGT edge-type attention with block-sparse skipping
# ----------------------------------------------------------------------------

def _hgt_attn_kernel(cnt_ref, q_ref, k_ref, v_ref, mask_ref, o_ref,
                     m_sc, l_sc, acc_sc, *, heads):
    """One (dst-tile, src-tile) step of HGT message passing.

    cnt_ref  : SMEM (Gq, Gk) int32 — edges per tile pair (scalar prefetch)
    q_ref    : (TQ, H*D) bf16 dst queries (lane-dense)
    k_ref    : (TK, H*D) bf16 src keys, a_rel * p_rel/sqrt(D) already folded in
    v_ref    : (TK, H*D) bf16 src values, m_rel already folded in
    mask_ref : (TQ, TK)  int8, 1 where an edge dst <- src exists
    o_ref    : (TQ, H*D) f32 aggregated messages (stored at the last src tile)
    scratch  : m_sc / l_sc / acc_sc (TQ, H*D) f32 — online-softmax state with
               per-head max/denom replicated over that head's D lanes, so the
               finalize is a single full-lane-width store (no head concat).
    """
    qi = pl.program_id(0)
    ki = pl.program_id(1)

    @pl.when(ki == 0)
    def _init():
        m_sc[...] = jnp.full(m_sc.shape, NEG_INF, m_sc.dtype)
        l_sc[...] = jnp.zeros(l_sc.shape, l_sc.dtype)
        acc_sc[...] = jnp.zeros(acc_sc.shape, acc_sc.dtype)

    # Block-sparse skip: tiles with no edges do no EUP/MXU/VPU work at all.
    @pl.when(cnt_ref[qi, ki] > 0)
    def _compute():
        tq, hd = q_ref.shape
        d = hd // heads

        # additive mask, computed once per block and shared across all heads
        neg = jnp.where(mask_ref[...].astype(jnp.float32) > 0.0, 0.0, NEG_INF)

        q = q_ref[...]
        k = k_ref[...]
        v = v_ref[...]

        dims = (((1,), (1,)), ((), ()))   # contract last dims: no K transpose
        for h in range(heads):            # heads is static & small: unrolled
            lo = h * d
            qh = q[:, lo:lo + d]
            kh = k[:, lo:lo + d]
            vh = v[:, lo:lo + d]

            s = jax.lax.dot_general(qh, kh, dims,
                                    preferred_element_type=jnp.float32) + neg
            m_prev = m_sc[:, lo:lo + d]                       # (TQ, D), cols equal
            m_new = jnp.maximum(m_prev, jnp.max(s, axis=-1, keepdims=True))
            alpha = jnp.exp(m_prev - m_new)
            e = jnp.exp(s - m_new[:, :1])                     # (TQ, TK) f32 probs
            l_sc[:, lo:lo + d] = alpha * l_sc[:, lo:lo + d] + jnp.sum(
                e, axis=-1, keepdims=True)
            acc_sc[:, lo:lo + d] = alpha * acc_sc[:, lo:lo + d] + jnp.dot(
                e.astype(MATMUL_DTYPE), vh, preferred_element_type=jnp.float32)
            m_sc[:, lo:lo + d] = m_new

    @pl.when(ki == pl.num_programs(1) - 1)
    def _finalize():
        l = l_sc[...]
        inv_l = pl.reciprocal(jnp.where(l > 0.0, l, 1.0), approx=True)
        # Rows whose running max never moved off the sentinel saw no edge at
        # all -> emit exact zeros (matches scatter-into-zeros semantics).
        scale = jnp.where(m_sc[...] > 0.5 * NEG_INF, inv_l, 0.0)
        o_ref[...] = (acc_sc[...] * scale).astype(o_ref.dtype)


def hgt_edge_attention(q, k, v, edge_index, n_dst, n_src, heads):
    """q: (Nd, H*D) bf16 dst queries; k/v: (Ns, H*D) bf16 with the per-edge-type
    relation matrices already folded in; edge_index: (2, E) int32 [src; dst]."""
    hd = q.shape[1]
    tq = _row_tile(n_dst, _ATTN_TQ)
    nd_p = _round_up(n_dst, tq)
    n_src8 = _round_up(n_src, 8)
    tk = n_src8 if n_src8 <= _ATTN_TK else _ATTN_TK
    ns_p = _round_up(n_src, tk)
    gq, gk = nd_p // tq, ns_p // tk

    src, dst = edge_index[0], edge_index[1]
    # TODO(synk): dense (Nd, Ns) adjacency is O(Nd*Ns) and de-duplicates parallel
    # edges; for very large / multi-edge graphs switch to CSR neighbour lists
    # gathered via scalar-prefetch offsets.
    mask = jnp.zeros((nd_p, ns_p), jnp.int8).at[dst, src].set(1)
    # per-(dst-tile, src-tile) edge counts -> SMEM, lets the kernel skip empty tiles
    counts = jnp.zeros((gq, gk), jnp.int32).at[dst // tq, src // tk].add(1)

    out = pl.pallas_call(
        partial(_hgt_attn_kernel, heads=heads),
        out_shape=jax.ShapeDtypeStruct((nd_p, hd), jnp.float32),
        grid_spec=pltpu.PrefetchScalarGridSpec(
            num_scalar_prefetch=1,
            grid=(gq, gk),
            in_specs=[
                pl.BlockSpec((tq, hd), lambda i, j, cnt: (i, 0)),   # q
                pl.BlockSpec((tk, hd), lambda i, j, cnt: (j, 0)),   # k (rel folded)
                pl.BlockSpec((tk, hd), lambda i, j, cnt: (j, 0)),   # v (rel folded)
                pl.BlockSpec((tq, tk), lambda i, j, cnt: (i, j)),   # int8 adjacency
            ],
            out_specs=pl.BlockSpec((tq, hd), lambda i, j, cnt: (i, 0)),
            scratch_shapes=[
                pltpu.VMEM((tq, hd), jnp.float32),   # running max (per head, D-replicated)
                pltpu.VMEM((tq, hd), jnp.float32),   # running denom
                pltpu.VMEM((tq, hd), jnp.float32),   # running weighted-value accumulator
            ],
        ),
        compiler_params=pltpu.CompilerParams(
            dimension_semantics=("parallel", "arbitrary"),
            vmem_limit_bytes=_VMEM_LIMIT),
    )(counts, _pad_rows(q, nd_p), _pad_rows(k, ns_p), _pad_rows(v, ns_p), mask)
    return out[:n_dst]


# ----------------------------------------------------------------------------
# kernel 3: fused layer epilogue   sigmoid(skip)*a_lin(gelu(agg)) + (1-a)*h_prev
# ----------------------------------------------------------------------------

def _epilogue_kernel(agg_ref, w_ref, b_ref, h_ref, alpha_ref, o_ref):
    g = _gelu(agg_ref[...])                                     # exact-erf GELU, f32
    y = jnp.dot(g.astype(MATMUL_DTYPE), w_ref[...],
                preferred_element_type=jnp.float32) + b_ref[...]
    alpha = alpha_ref[0, 0]                                     # scalar from SMEM
    o_ref[...] = (alpha * y + (1.0 - alpha) * h_ref[...]).astype(o_ref.dtype)


def hgt_epilogue(agg, w, b, h_prev, skip, *, block_m=None):
    n, hid = agg.shape
    tm = _row_tile(n, block_m or _BLOCK_M)
    n_p = _round_up(n, tm)
    alpha = jax.nn.sigmoid(skip).reshape(1, 1).astype(jnp.float32)
    # TODO(synk): column-tile the (hid, hid) a_lin weight for hid >= 2048 so the
    # resident weight also fits v7x's 64 MiB VMEM.
    out = pl.pallas_call(
        _epilogue_kernel,
        out_shape=jax.ShapeDtypeStruct((n_p, hid), jnp.float32),
        grid=(n_p // tm,),
        in_specs=[
            pl.BlockSpec((tm, hid), lambda i: (i, 0)),           # agg
            pl.BlockSpec((hid, hid), lambda i: (0, 0)),          # a_lin weight (bf16)
            pl.BlockSpec((1, hid), lambda i: (0, 0)),            # a_lin bias
            pl.BlockSpec((tm, hid), lambda i: (i, 0)),           # skip input h_prev
            pl.BlockSpec(memory_space=pltpu.MemorySpace.SMEM),   # sigmoid(skip)
        ],
        out_specs=pl.BlockSpec((tm, hid), lambda i: (i, 0)),
        compiler_params=pltpu.CompilerParams(
            dimension_semantics=("parallel",),
            vmem_limit_bytes=_VMEM_LIMIT),
    )(_pad_rows(agg, n_p), w.astype(MATMUL_DTYPE), b.reshape(1, hid).astype(jnp.float32),
      _pad_rows(h_prev, n_p), alpha)
    return out[:n]


# ----------------------------------------------------------------------------
# Parameter construction (deterministic, synthetic)
# ----------------------------------------------------------------------------

def _init_linear(key, in_c, out_c):
    kw, kb = jax.random.split(key)
    w = jax.random.normal(kw, (in_c, out_c), jnp.float32) * (1.0 / math.sqrt(in_c))
    b = jax.random.normal(kb, (out_c,), jnp.float32) * 0.01
    return w, b


def init_hgt_params(key, in_channels, node_types, edge_types,
                    hidden_channels, out_channels, num_heads, num_layers):
    d = hidden_channels // num_heads
    params = {"lin_dict": {}, "convs": [], "lin": None}
    keys = jax.random.split(key, 3)

    for i, nt in enumerate(node_types):
        params["lin_dict"][nt] = _init_linear(
            jax.random.fold_in(keys[0], i), in_channels[nt], hidden_channels)

    for layer in range(num_layers):
        lk = jax.random.fold_in(keys[1], layer)
        conv = {"k_lin": {}, "q_lin": {}, "v_lin": {}, "a_lin": {}, "skip": {},
                "a_rel": {}, "m_rel": {}, "p_rel": {}}
        for i, nt in enumerate(node_types):
            nk = jax.random.fold_in(lk, i)
            sub = jax.random.split(nk, 4)
            conv["k_lin"][nt] = _init_linear(sub[0], hidden_channels, hidden_channels)
            conv["q_lin"][nt] = _init_linear(sub[1], hidden_channels, hidden_channels)
            conv["v_lin"][nt] = _init_linear(sub[2], hidden_channels, hidden_channels)
            conv["a_lin"][nt] = _init_linear(sub[3], hidden_channels, hidden_channels)
            conv["skip"][nt] = jnp.float32(1.0)  # torch init: ones_(skip)
        for j, et in enumerate(edge_types):
            ek = jax.random.fold_in(lk, 1000 + j)
            sub = jax.random.split(ek, 2)
            key_et = "__".join(et)
            conv["a_rel"][key_et] = jax.random.normal(sub[0], (num_heads, d, d),
                                                      jnp.float32) * (1.0 / math.sqrt(d))
            conv["m_rel"][key_et] = jax.random.normal(sub[1], (num_heads, d, d),
                                                      jnp.float32) * (1.0 / math.sqrt(d))
            conv["p_rel"][key_et] = jnp.ones((num_heads,), jnp.float32)
        params["convs"].append(conv)

    params["lin"] = _init_linear(keys[2], hidden_channels, out_channels)
    return params


# ----------------------------------------------------------------------------
# HGT forward pass
# ----------------------------------------------------------------------------

def hgt_forward(params, x_dict, edge_index_dict, labeled_class,
                node_counts, num_heads, hidden_channels):
    d = hidden_channels // num_heads
    hc = hidden_channels

    # per-node-type input projection with fused ReLU
    h_dict = {nt: linear(x, *params["lin_dict"][nt], post_act="relu")
              for nt, x in x_dict.items()}

    for conv in params["convs"]:
        # dst queries, stored bf16 (MXU-native attention operands, half the DMA)
        q_dict = {nt: linear(h, *conv["q_lin"][nt], out_dtype=MATMUL_DTYPE)
                  for nt, h in h_dict.items()}

        out_dict = {nt: [] for nt in h_dict}
        for edge_type, edge_index in edge_index_dict.items():
            src_t, _, dst_t = edge_type
            key_et = "__".join(edge_type)
            # Fold p_rel/sqrt(D) into the key relation, then fold both relation
            # matrices into the K/V projection weights: the attention kernel
            # never touches an (H*D, H*D) relation matmul.
            a_bd = _block_diag(conv["a_rel"][key_et] *
                               (conv["p_rel"][key_et] / math.sqrt(d))[:, None, None])
            m_bd = _block_diag(conv["m_rel"][key_et])
            wk, bk = conv["k_lin"][src_t]
            wv, bv = conv["v_lin"][src_t]
            w_kv = jnp.concatenate([wk @ a_bd, wv @ m_bd], axis=1)
            b_kv = jnp.concatenate([bk @ a_bd, bv @ m_bd])
            kv = linear(h_dict[src_t], w_kv, b_kv, out_dtype=MATMUL_DTYPE)
            out = hgt_edge_attention(q_dict[dst_t], kv[:, :hc], kv[:, hc:],
                                     edge_index, node_counts[dst_t],
                                     node_counts[src_t], num_heads)
            out_dict[dst_t].append(out)

        new_h = {}
        for nt, outs in out_dict.items():
            if len(outs) == 0:
                new_h[nt] = None                  # matches PyG HGTConv behaviour
                continue
            agg = outs[0]
            for o in outs[1:]:
                agg = agg + o                     # group='sum' over edge types
            # fused: gelu(agg) @ a_lin + bias, blended with h_prev by sigmoid(skip)
            new_h[nt] = hgt_epilogue(agg, *conv["a_lin"][nt], h_dict[nt],
                                     conv["skip"][nt])
        h_dict = new_h

    logits = linear(h_dict[labeled_class], *params["lin"])
    return logits, True


# ----------------------------------------------------------------------------
# Demo
# ----------------------------------------------------------------------------

if __name__ == "__main__":
    key = jax.random.PRNGKey(0)

    hidden_channels, num_heads, num_layers, out_channels = 32, 2, 1, 4
    node_types = ("item", "user")
    edge_types = (("user", "buys", "item"), ("item", "rev_buys", "user"))
    node_counts = {"item": 12, "user": 16}
    in_channels = {"item": 8, "user": 6}
    labeled_class = "item"

    kx1, kx2, kp = jax.random.split(key, 3)
    x_dict = {
        "item": jax.random.normal(kx1, (node_counts["item"], in_channels["item"]),
                                  jnp.float32),
        "user": jax.random.normal(kx2, (node_counts["user"], in_channels["user"]),
                                  jnp.float32),
    }

    # deterministic, duplicate-free edge lists;  edge_index = [src_idx; dst_idx]
    ub_src, ub_dst = [], []
    for u in range(node_counts["user"]):
        for j in range(2):
            ub_src.append(u)
            ub_dst.append((2 * u + 5 * j) % node_counts["item"])
    iu_src, iu_dst = [], []
    for i in range(node_counts["item"]):
        for j in range(2):
            iu_src.append(i)
            iu_dst.append((3 * i + 7 * j) % node_counts["user"])
    edge_index_dict = {
        ("user", "buys", "item"): jnp.array([ub_src, ub_dst], dtype=jnp.int32),
        ("item", "rev_buys", "user"): jnp.array([iu_src, iu_dst], dtype=jnp.int32),
    }

    params = init_hgt_params(kp, in_channels, node_types, edge_types,
                             hidden_channels, out_channels, num_heads, num_layers)

    logits, flag = hgt_forward(params, x_dict, edge_index_dict, labeled_class,
                               node_counts, num_heads, hidden_channels)
    logits = jax.block_until_ready(logits)
    assert logits.shape == (node_counts[labeled_class], out_channels)
    assert bool(jnp.all(jnp.isfinite(logits))) and flag is True
    print("KERNEL_OK")
</pallas_src>

<mosaic_0001>
module attributes {stable_mosaic.version = 11 : i64} {
  func.func @_linear_kernel(%arg0: i32, %arg1: i32, %arg2: memref<16x8xf32, #tpu.memory_space<vmem>>, %arg3: memref<8x32xbf16, #tpu.memory_space<vmem>>, %arg4: memref<1x32xf32, #tpu.memory_space<vmem>>, %arg5: memref<16x32xf32, #tpu.memory_space<vmem>>) attributes {dimension_semantics = [#tpu.dimension_semantics<parallel>, #tpu.dimension_semantics<parallel>], iteration_bounds = array<i64: 1, 1>, scalar_prefetch = 0 : i64, scratch_operands = 0 : i64, tpu.core_type = #tpu.core_type<tc>, window_params = [{transform_indices = @transform_0, window_bounds = array<i64: 16, 8>}, {transform_indices = @transform_1, window_bounds = array<i64: 8, 32>}, {transform_indices = @transform_2, window_bounds = array<i64: 1, 32>}, {transform_indices = @transform_3, window_bounds = array<i64: 16, 32>}]} {
    %c0 = arith.constant 0 : index
    %c0_0 = arith.constant 0 : index
    %0 = vector.load %arg2[%c0, %c0_0] : memref<16x8xf32, #tpu.memory_space<vmem>>, vector<16x8xf32>
    %1 = arith.truncf %0 : vector<16x8xf32> to vector<16x8xbf16>
    %c0_1 = arith.constant 0 : index
    %c0_2 = arith.constant 0 : index
    %2 = vector.load %arg3[%c0_1, %c0_2] : memref<8x32xbf16, #tpu.memory_space<vmem>>, vector<8x32xbf16>
    %cst = arith.constant dense<0.000000e+00> : vector<16x32xf32>
    %3 = tpu.matmul %1, %2, %cst {dimension_numbers = #tpu.dot_dimension_numbers<[1], [0], [0], [1], [0, 0, 1, 1], [], []>} : vector<16x8xbf16>, vector<8x32xbf16>, vector<16x32xf32> -> vector<16x32xf32>
    %c0_3 = arith.constant 0 : index
    %c0_4 = arith.constant 0 : index
    %4 = vector.load %arg4[%c0_3, %c0_4] : memref<1x32xf32, #tpu.memory_space<vmem>>, vector<1x32xf32>
    %5 = vector.broadcast %4 : vector<1x32xf32> to vector<16x32xf32>
    %6 = arith.addf %3, %5 : vector<16x32xf32>
    %cst_5 = arith.constant 0.000000e+00 : f32
    %7 = vector.broadcast %cst_5 : f32 to vector<16x32xf32>
    %8 = arith.maximumf %6, %7 : vector<16x32xf32>
    %c0_6 = arith.constant 0 : index
    %c0_7 = arith.constant 0 : index
    %9 = vector.load %arg5[%c0_6, %c0_7] : memref<16x32xf32, #tpu.memory_space<vmem>>, vector<16x32xf32>
    tpu.vector_store %arg5[%c0_6, %c0_7], %8 {strides = array<i32>} : memref<16x32xf32, #tpu.memory_space<vmem>>, vector<16x32xf32>,
    return
  }
  func.func @transform_0(%arg0: i32, %arg1: i32) -> (i32, i32) {
    %c0_i32 = arith.constant 0 : i32
    %c0_i32_0 = arith.constant 0 : i32
    return %arg0, %c0_i32 : i32, i32
  }
  func.func @transform_1(%arg0: i32, %arg1: i32) -> (i32, i32) {
    %c0_i32 = arith.constant 0 : i32
    %c0_i32_0 = arith.constant 0 : i32
    return %c0_i32, %arg1 : i32, i32
  }
  func.func @transform_2(%arg0: i32, %arg1: i32) -> (i32, i32) {
    %c0_i32 = arith.constant 0 : i32
    %c0_i32_0 = arith.constant 0 : i32
    return %c0_i32, %arg1 : i32, i32
  }
  func.func @transform_3(%arg0: i32, %arg1: i32) -> (i32, i32) {
    %c0_i32 = arith.constant 0 : i32
    return %arg0, %arg1 : i32, i32
  }
}

</mosaic_0001>

<bundles_post_ra>
// kernel: tpu_custom_call.1
= control target key start
LH: loop header
LB: loop body
LE: loop exit
PB: predicated region body
PF: predicated region fallthrough
CT: control target
= control target key end

     0   :  { %vm28_vm0 = vcmask 1043456   ;;  %vm24_vm1 = vcmask 64512   ;;  %s138_s0 = inlined_call_operand.vmem [shape: f32[16,8], index: 0, kind: input, shape index: {}]   ;;  %s139_s1 = inlined_call_operand.vmem [shape: bf16[8,32], index: 1, kind: input, shape index: {}]   ;;  %s140_s2 = inlined_call_operand.vmem [shape: f32[1,32], index: 2, kind: input, shape index: {}]   ;;  %s141_s3 = inlined_call_operand.hbm [shape: f32[16,32], index: 3, kind: output, shape index: {}]  }
   0x1   :  { %v19_v0 = vld [vmem:[%s139_s1] sm:$0xf]  ;;  %v17_v2 = vld [vmem:[%s138_s0 + $0x8] sm:$0xff] }
   0x2   :  { %v16_v1 = vld [vmem:[%s138_s0] sm:$0xff]  ;;  %v30_v3 = vsel %vm28_vm0, %v19_v0, 0 }
   0x3   :  { %v18_v4 = vpack.c.bf16 %v17_v2, %v16_v1  ;;  %39 = vmatpush.bf16.msra.mxu0 %v30_v3 }
   0x4   :  { %8 = vsyncpa [#allocation3], 0  ;;  %v73_v5 = vld [vmem:[%s140_s2] ss:$0 sm:$0xff]  ;;  %vm48_vm2 = vcmask 261120   ;;  %s100_s1 = smov [#allocation2]  }
   0x5   :  { %s55_s20 = sshll.u32 %s100_s1, 4  ;;  %s57_s0 = sshll.u32 %s141_s3, 4  ;;  %s56_s20 = int_to_ptr.vmem [resolvable:$true] %s55_s20  ;;  %s58_s0 = int_to_ptr.hbm [resolvable:$true] %s57_s0 }
   0x6   :  { %69 = vmatmul.msk.bf16.vlgmr.msra.gmra.mxu0 %vm24_vm1, %v18_v4  ;;  %s101_s23 = smov 128   ;;  %s102_s24 = smov 8  }
  0x83   :  { %v41_v6 = vpop.f32.mrf.mxu0 }
  0x84   :  { %v42_v7 = vadd.f32 %v73_v5, %v41_v6 }
  0x86   :  { %v46_v8 = vmax.f32 %v42_v7, 0.0 }
  0x88   :  { %49 = vst.msk [vmem:[#allocation2] sm:$0xff] %vm48_vm2, %v46_v8 }
  0x8b   :  { %v43_v9 = vpop.f32.mrf.mxu0 }
  0x8c   :  { %v44_v10 = vadd.f32 %v73_v5, %v43_v9 }
  0x8e   :  { %v47_v11 = vmax.f32 %v44_v10, 0.0 }
  0x90   :  { %50 = vst.msk [vmem:[#allocation2 + $0x8] sm:$0xff] %vm48_vm2, %v47_v11 }
  0x91   :  { %63 = dma.vmem_to_hbm [thread:$0]  %s56_s20, 256, %s58_s0, [#allocation3], %s101_s23, %s101_s23, %s102_s24  }
  0x92   :  { %98 = dma.done.wait [#allocation3], 256  }
  0x93   :  { %99 = vsyncadd [#allocation3], 4294967040 }
  0x94   :  { %68 = vsyncpa [#allocation3], 1 }

</bundles_post_ra>
